<compile_context>
chip_gen: v7x
topology: tpu7x:2x2x1
jax: 0.10.0
libtpu: 0.0.40
codegen_flags: <defaults>
</compile_context>

<pallas_src>
import numpy as np
import jax
import jax.numpy as jnp
from jax.experimental import pallas as pl
from jax.experimental.pallas import tpu as pltpu

LEAKY_SLOPE = 0.05   # nn.LeakyReLU(alpha=0.05) inside GATLayer
NEG_MASK = -1e30     # additive mask for non-edges (exp underflows to exactly 0.0)


# ----------------------------------------------------------------------------- kernel


def _gat_layer(x, adj_mask, w, a_src, a_dst, bias):
    """One full-graph GAT layer, everything resident in VMEM/vregs.

    Returns (out (N, H), alpha (N, N) row-normalized attention)."""
    wh = jnp.dot(x, w, preferred_element_type=jnp.float32)                 # (N, H)
    # source score: a1 . Wh_i  -> (N, 1)
    s_src = jnp.dot(wh, a_src, preferred_element_type=jnp.float32)         # (N, 1)
    # destination score directly as a lane row: a2 . Wh_j -> (1, N), contract H
    s_dst = jax.lax.dot_general(a_dst, wh, (((1,), (1,)), ((), ())),
                                preferred_element_type=jnp.float32)         # (1, N)

    e = s_src + s_dst + bias                                                # (N, N)
    e = jnp.where(e > 0, e, LEAKY_SLOPE * e)                                # leakyrelu
    e = jnp.where(adj_mask, e, NEG_MASK)                                    # mask BEFORE exp

    m = jnp.max(e, axis=1, keepdims=True)
    p = jnp.exp(e - m)                                                      # off-edge -> 0.0
    l = jnp.sum(p, axis=1, keepdims=True)

    # EUP approx reciprocal + one Newton step (EUP slot is otherwise idle)
    r = pl.reciprocal(l, approx=True)
    r = r * (2.0 - l * r)
    alpha = p * r                                                           # (N, N)

    out = jnp.dot(alpha, wh, preferred_element_type=jnp.float32)            # (N, H)
    return out, alpha


def _gnn_fused_kernel(x_ref, adj_ref, w1_ref, a1s_ref, a1d_ref,
                      w2_ref, a2s_ref, a2d_ref, wfc_ref, bfc_ref,
                      b_ref, src_ref, dst_ref,
                      logp_ref, aedge_ref):
    """Fused GNN.forward: mp1 -> relu -> mp2 -> relu -> fc -> log_softmax (+edge alpha)."""
    adj_mask = adj_ref[...] > 0.0

    # ---- mp1 + ReLU (dropout is identity in eval mode)
    h1, _ = _gat_layer(x_ref[...], adj_mask, w1_ref[...],
                       a1s_ref[...], a1d_ref[...], b_ref[0, 0])
    h1 = jnp.maximum(h1, 0.0)

    # ---- mp2 + ReLU
    h2, alpha2 = _gat_layer(h1, adj_mask, w2_ref[...],
                            a2s_ref[...], a2d_ref[...], b_ref[0, 1])
    h2 = jnp.maximum(h2, 0.0)

    # ---- classifier + log_softmax(dim=1)
    logits = jnp.dot(h2, wfc_ref[...], preferred_element_type=jnp.float32) + bfc_ref[...]
    mx = jnp.max(logits, axis=1, keepdims=True)
    z = logits - mx
    lse = jnp.log(jnp.sum(jnp.exp(z), axis=1, keepdims=True))
    logp_ref[...] = z - lse

    # ---- in-kernel per-edge gather: alpha_edges[k] = alpha2[src[k], dst[k]]
    n = alpha2.shape[0]
    e_pad = src_ref.shape[1]
    node_iota = jax.lax.broadcasted_iota(jnp.int32, (n, e_pad), 0)          # (N, E_pad)
    dst_onehot = (node_iota == dst_ref[...]).astype(jnp.float32)            # (N, E_pad)
    src_onehot = (node_iota == src_ref[...]).astype(jnp.float32)            # (N, E_pad)
    # column k of gathered_cols = alpha2[:, dst[k]]
    gathered_cols = jnp.dot(alpha2, dst_onehot, preferred_element_type=jnp.float32)
    # pick row src[k] of each gathered column -> lane-dense (1, E_pad) output
    aedge_ref[...] = jnp.sum(gathered_cols * src_onehot, axis=0, keepdims=True)


# ----------------------------------------------------------------------------- wrapper


def gnn_forward_pallas(x, adj, params, src, dst):
    """Full GNN.forward in a single pallas_call; returns (log_probs, per-edge alpha2)."""
    n, f = x.shape
    h = params["w1_t"].shape[1]
    c = params["wfc_t"].shape[1]
    e = src.shape[0]
    e_pad = ((e + 127) // 128) * 128                                        # lane-dense edge row

    src_pad = jnp.zeros((1, e_pad), jnp.int32).at[0, :e].set(src)
    dst_pad = jnp.zeros((1, e_pad), jnp.int32).at[0, :e].set(dst)

    logp, aedge = pl.pallas_call(
        _gnn_fused_kernel,
        out_shape=(jax.ShapeDtypeStruct((n, c), jnp.float32),
                   jax.ShapeDtypeStruct((1, e_pad), jnp.float32)),
        grid_spec=pl.GridSpec(
            grid=(1,),
            in_specs=[
                pl.BlockSpec((n, f), lambda i: (0, 0)),                     # x
                pl.BlockSpec((n, n), lambda i: (0, 0)),                     # adjacency
                pl.BlockSpec((f, h), lambda i: (0, 0)),                     # W1^T
                pl.BlockSpec((h, 1), lambda i: (0, 0)),                     # a1 (src half)
                pl.BlockSpec((1, h), lambda i: (0, 0)),                     # a1 (dst half)
                pl.BlockSpec((h, h), lambda i: (0, 0)),                     # W2^T
                pl.BlockSpec((h, 1), lambda i: (0, 0)),                     # a2 (src half)
                pl.BlockSpec((1, h), lambda i: (0, 0)),                     # a2 (dst half)
                pl.BlockSpec((h, c), lambda i: (0, 0)),                     # classifier W^T
                pl.BlockSpec((1, c), lambda i: (0, 0)),                     # classifier bias
                pl.BlockSpec(memory_space=pltpu.MemorySpace.SMEM),          # [b1, b2] scalars
                pl.BlockSpec((1, e_pad), lambda i: (0, 0)),                 # edge src ids
                pl.BlockSpec((1, e_pad), lambda i: (0, 0)),                 # edge dst ids
            ],
            out_specs=[pl.BlockSpec((n, c), lambda i: (0, 0)),
                       pl.BlockSpec((1, e_pad), lambda i: (0, 0))],
        ),
        compiler_params=pltpu.CompilerParams(
            dimension_semantics=("arbitrary",),
            vmem_limit_bytes=32 * 1024 * 1024,   # explicit budget; tiny working set
        ),
    )(x, adj, params["w1_t"], params["a1_src"], params["a1_dst"],
      params["w2_t"], params["a2_src"], params["a2_dst"],
      params["wfc_t"], params["bfc"], params["b12"], src_pad, dst_pad)

    return logp, aedge[0, :e]


# ----------------------------------------------------------------------------- reference


def _gat_ref(x, adj, w_t, a_src, a_dst, bias):
    wh = x @ w_t
    e = wh @ a_src + (wh @ a_dst.T).T + bias
    e = jnp.where(e > 0, e, LEAKY_SLOPE * e)
    hmat = jnp.exp(e) * adj
    alpha = hmat / jnp.sum(hmat, axis=1, keepdims=True)
    return alpha @ wh, alpha


def gnn_forward_ref(x, adj, params, src, dst):
    b1 = params["b12"][0, 0]
    b2 = params["b12"][0, 1]
    h1, _ = _gat_ref(x, adj, params["w1_t"], params["a1_src"], params["a1_dst"], b1)
    h1 = jnp.maximum(h1, 0.0)
    h2, alpha2 = _gat_ref(h1, adj, params["w2_t"], params["a2_src"], params["a2_dst"], b2)
    h2 = jnp.maximum(h2, 0.0)
    logits = h2 @ params["wfc_t"] + params["bfc"]
    return jax.nn.log_softmax(logits, axis=1), alpha2[src, dst]


# ----------------------------------------------------------------------------- main


if __name__ == "__main__":
    N_NODES, N_FEAT, N_HIDDEN, N_CLASS = 16, 8, 32, 8

    key = jax.random.PRNGKey(0)
    kx, k1w, k1a, k1b, k2w, k2a, k2b, kfw, kfb = jax.random.split(key, 9)

    # mp1: fc Linear(nfeat, nhid, bias=False); a Linear(2*nhid, 1)
    w1 = jax.random.uniform(k1w, (N_HIDDEN, N_FEAT), jnp.float32, -0.3, 0.3)
    a1w = jax.random.uniform(k1a, (1, 2 * N_HIDDEN), jnp.float32, -0.1, 0.1)
    b1 = jax.random.uniform(k1b, (1,), jnp.float32, -0.1, 0.1)
    # mp2: fc Linear(nhid, nhid, bias=False); a Linear(2*nhid, 1)
    w2 = jax.random.uniform(k2w, (N_HIDDEN, N_HIDDEN), jnp.float32, -0.2, 0.2)
    a2w = jax.random.uniform(k2a, (1, 2 * N_HIDDEN), jnp.float32, -0.1, 0.1)
    b2 = jax.random.uniform(k2b, (1,), jnp.float32, -0.1, 0.1)
    # classifier: Linear(nhid, nclass)
    wfc = jax.random.uniform(kfw, (N_CLASS, N_HIDDEN), jnp.float32, -0.2, 0.2)
    bfc = jax.random.uniform(kfb, (N_CLASS,), jnp.float32, -0.1, 0.1)

    params = dict(
        w1_t=w1.T,
        a1_src=a1w[0, :N_HIDDEN].reshape(N_HIDDEN, 1),   # multiplies Wh[src] (row node)
        a1_dst=a1w[0, N_HIDDEN:].reshape(1, N_HIDDEN),   # multiplies Wh[dst] (col node)
        w2_t=w2.T,
        a2_src=a2w[0, :N_HIDDEN].reshape(N_HIDDEN, 1),
        a2_dst=a2w[0, N_HIDDEN:].reshape(1, N_HIDDEN),
        wfc_t=wfc.T,
        bfc=bfc.reshape(1, N_CLASS),
        b12=jnp.concatenate([b1, b2]).reshape(1, 2),     # attention biases in SMEM
    )

    # deterministic graph: ring + self-loops; edge list in coalesced (row, col) COO order
    edges = sorted({(i, j) for i in range(N_NODES)
                    for j in (i, (i + 1) % N_NODES, (i - 1) % N_NODES)})
    src = jnp.asarray([e[0] for e in edges], jnp.int32)
    dst = jnp.asarray([e[1] for e in edges], jnp.int32)
    adj_dense = jnp.zeros((N_NODES, N_NODES), jnp.float32).at[src, dst].set(1.0)

    x = jax.random.normal(kx, (N_NODES, N_FEAT), jnp.float32)

    # run the fused Pallas kernel
    logp, alpha_edges = gnn_forward_pallas(x, adj_dense, params, src, dst)
    logp = jax.block_until_ready(logp)
    alpha_edges = jax.block_until_ready(alpha_edges)

    # silent correctness check against a pure-JAX reference of the PyTorch semantics
    logp_ref, alpha_ref = gnn_forward_ref(x, adj_dense, params, src, dst)
    np.testing.assert_allclose(np.asarray(logp), np.asarray(logp_ref), rtol=1e-4, atol=1e-5)
    np.testing.assert_allclose(np.asarray(alpha_edges), np.asarray(alpha_ref),
                               rtol=1e-4, atol=1e-6)

    print("KERNEL_OK")
</pallas_src>

<mosaic_0001>
module attributes {stable_mosaic.version = 11 : i64} {
  func.func @_gnn_fused_kernel(%arg0: i32, %arg1: memref<16x8xf32, #tpu.memory_space<vmem>>, %arg2: memref<16x16xf32, #tpu.memory_space<vmem>>, %arg3: memref<8x32xf32, #tpu.memory_space<vmem>>, %arg4: memref<32x1xf32, #tpu.memory_space<vmem>>, %arg5: memref<1x32xf32, #tpu.memory_space<vmem>>, %arg6: memref<32x32xf32, #tpu.memory_space<vmem>>, %arg7: memref<32x1xf32, #tpu.memory_space<vmem>>, %arg8: memref<1x32xf32, #tpu.memory_space<vmem>>, %arg9: memref<32x8xf32, #tpu.memory_space<vmem>>, %arg10: memref<1x8xf32, #tpu.memory_space<vmem>>, %arg11: memref<1x2xf32, #tpu.memory_space<smem>>, %arg12: memref<1x128xi32, #tpu.memory_space<vmem>>, %arg13: memref<1x128xi32, #tpu.memory_space<vmem>>, %arg14: memref<16x8xf32, #tpu.memory_space<vmem>>, %arg15: memref<1x128xf32, #tpu.memory_space<vmem>>) attributes {dimension_semantics = [#tpu.dimension_semantics<arbitrary>], iteration_bounds = array<i64: 1>, scalar_prefetch = 0 : i64, scratch_operands = 0 : i64, tpu.core_type = #tpu.core_type<tc>, window_params = [{pipeline_mode = #tpu.pipeline_mode<synchronous>, transform_indices = @transform_0, window_bounds = array<i64: 16, 8>}, {pipeline_mode = #tpu.pipeline_mode<synchronous>, transform_indices = @transform_1, window_bounds = array<i64: 16, 16>}, {pipeline_mode = #tpu.pipeline_mode<synchronous>, transform_indices = @transform_2, window_bounds = array<i64: 8, 32>}, {pipeline_mode = #tpu.pipeline_mode<synchronous>, transform_indices = @transform_3, window_bounds = array<i64: 32, 1>}, {pipeline_mode = #tpu.pipeline_mode<synchronous>, transform_indices = @transform_4, window_bounds = array<i64: 1, 32>}, {pipeline_mode = #tpu.pipeline_mode<synchronous>, transform_indices = @transform_5, window_bounds = array<i64: 32, 32>}, {pipeline_mode = #tpu.pipeline_mode<synchronous>, transform_indices = @transform_6, window_bounds = array<i64: 32, 1>}, {pipeline_mode = #tpu.pipeline_mode<synchronous>, transform_indices = @transform_7, window_bounds = array<i64: 1, 32>}, {pipeline_mode = #tpu.pipeline_mode<synchronous>, transform_indices = @transform_8, window_bounds = array<i64: 32, 8>}, {pipeline_mode = #tpu.pipeline_mode<synchronous>, transform_indices = @transform_9, window_bounds = array<i64: 1, 8>}, {transform_indices = @transform_10, window_bounds = array<i64: 1, 2>}, {pipeline_mode = #tpu.pipeline_mode<synchronous>, transform_indices = @transform_11, window_bounds = array<i64: 1, 128>}, {pipeline_mode = #tpu.pipeline_mode<synchronous>, transform_indices = @transform_12, window_bounds = array<i64: 1, 128>}, {pipeline_mode = #tpu.pipeline_mode<synchronous>, transform_indices = @transform_13, window_bounds = array<i64: 16, 8>}, {pipeline_mode = #tpu.pipeline_mode<synchronous>, transform_indices = @transform_14, window_bounds = array<i64: 1, 128>}]} {
    %c0 = arith.constant 0 : index
    %c0_0 = arith.constant 0 : index
    %0 = vector.load %arg2[%c0, %c0_0] : memref<16x16xf32, #tpu.memory_space<vmem>>, vector<16x16xf32>
    %cst = arith.constant 0.000000e+00 : f32
    %1 = vector.broadcast %cst : f32 to vector<16x16xf32>
    %2 = arith.cmpf ogt, %0, %1 : vector<16x16xf32>
    %c0_1 = arith.constant 0 : index
    %c0_2 = arith.constant 0 : index
    %3 = vector.load %arg1[%c0_1, %c0_2] : memref<16x8xf32, #tpu.memory_space<vmem>>, vector<16x8xf32>
    %c0_3 = arith.constant 0 : index
    %c0_4 = arith.constant 0 : index
    %4 = vector.load %arg3[%c0_3, %c0_4] : memref<8x32xf32, #tpu.memory_space<vmem>>, vector<8x32xf32>
    %c0_5 = arith.constant 0 : index
    %c0_6 = arith.constant 0 : index
    %5 = vector.load %arg4[%c0_5, %c0_6] : memref<32x1xf32, #tpu.memory_space<vmem>>, vector<32x1xf32>
    %c0_7 = arith.constant 0 : index
    %c0_8 = arith.constant 0 : index
    %6 = vector.load %arg5[%c0_7, %c0_8] : memref<1x32xf32, #tpu.memory_space<vmem>>, vector<1x32xf32>
    %c0_9 = arith.constant 0 : index
    %c0_10 = arith.constant 0 : index
    %7 = memref.load %arg11[%c0_9, %c0_10] : memref<1x2xf32, #tpu.memory_space<smem>>
    %cst_11 = arith.constant dense<0.000000e+00> : vector<16x32xf32>
    %8 = tpu.matmul %3, %4, %cst_11 {dimension_numbers = #tpu.dot_dimension_numbers<[1], [0], [0], [1], [0, 0, 1, 1], [], []>} : vector<16x8xf32>, vector<8x32xf32>, vector<16x32xf32> -> vector<16x32xf32>
    %cst_12 = arith.constant dense<0.000000e+00> : vector<16x1xf32>
    %9 = tpu.matmul %8, %5, %cst_12 {dimension_numbers = #tpu.dot_dimension_numbers<[1], [0], [0], [1], [0, 0, 1, 1], [], []>} : vector<16x32xf32>, vector<32x1xf32>, vector<16x1xf32> -> vector<16x1xf32>
    %cst_13 = arith.constant dense<0.000000e+00> : vector<1x16xf32>
    %10 = tpu.matmul %6, %8, %cst_13 {dimension_numbers = #tpu.dot_dimension_numbers<[1], [1], [0], [0], [0, 0, 1, 0], [], []>} : vector<1x32xf32>, vector<16x32xf32>, vector<1x16xf32> -> vector<1x16xf32>
    %11 = vector.broadcast %9 : vector<16x1xf32> to vector<16x16xf32>
    %12 = vector.broadcast %10 : vector<1x16xf32> to vector<16x16xf32>
    %13 = arith.addf %11, %12 : vector<16x16xf32>
    %14 = vector.broadcast %7 : f32 to vector<16x16xf32>
    %15 = arith.addf %13, %14 : vector<16x16xf32>
    %cst_14 = arith.constant 0.000000e+00 : f32
    %16 = vector.broadcast %cst_14 : f32 to vector<16x16xf32>
    %17 = arith.cmpf ogt, %15, %16 : vector<16x16xf32>
    %cst_15 = arith.constant 5.000000e-02 : f32
    %18 = vector.broadcast %cst_15 : f32 to vector<16x16xf32>
    %19 = arith.mulf %18, %15 : vector<16x16xf32>
    %20 = arith.select %17, %15, %19 : vector<16x16xi1>, vector<16x16xf32>
    %cst_16 = arith.constant -1.000000e+30 : f32
    %21 = vector.broadcast %cst_16 : f32 to vector<16x16xf32>
    %22 = arith.select %2, %20, %21 : vector<16x16xi1>, vector<16x16xf32>
    %cst_17 = arith.constant dense<0xFF800000> : vector<16xf32>
    %23 = vector.multi_reduction <maximumf>, %22, %cst_17 [1] : vector<16x16xf32> to vector<16xf32>
    %24 = vector.shape_cast %23 : vector<16xf32> to vector<16x1xf32>
    %25 = vector.broadcast %24 : vector<16x1xf32> to vector<16x16xf32>
    %26 = arith.subf %22, %25 : vector<16x16xf32>
    %27 = math.exp %26 : vector<16x16xf32>
    %cst_18 = arith.constant dense<0.000000e+00> : vector<16xf32>
    %28 = vector.multi_reduction <add>, %27, %cst_18 [1] : vector<16x16xf32> to vector<16xf32>
    %29 = vector.shape_cast %28 : vector<16xf32> to vector<16x1xf32>
    %30 = tpu.reciprocal %29 {approx = true} : vector<16x1xf32> -> vector<16x1xf32>
    %31 = arith.mulf %29, %30 : vector<16x1xf32>
    %cst_19 = arith.constant 2.000000e+00 : f32
    %32 = vector.broadcast %cst_19 : f32 to vector<16x1xf32>
    %33 = arith.subf %32, %31 : vector<16x1xf32>
    %34 = arith.mulf %30, %33 : vector<16x1xf32>
    %35 = vector.broadcast %34 : vector<16x1xf32> to vector<16x16xf32>
    %36 = arith.mulf %27, %35 : vector<16x16xf32>
    %cst_20 = arith.constant dense<0.000000e+00> : vector<16x32xf32>
    %37 = tpu.matmul %36, %8, %cst_20 {dimension_numbers = #tpu.dot_dimension_numbers<[1], [0], [0], [1], [0, 0, 1, 1], [], []>} : vector<16x16xf32>, vector<16x32xf32>, vector<16x32xf32> -> vector<16x32xf32>
    %cst_21 = arith.constant 0.000000e+00 : f32
    %38 = vector.broadcast %cst_21 : f32 to vector<16x32xf32>
    %39 = arith.maximumf %37, %38 : vector<16x32xf32>
    %c0_22 = arith.constant 0 : index
    %c0_23 = arith.constant 0 : index
    %40 = vector.load %arg6[%c0_22, %c0_23] : memref<32x32xf32, #tpu.memory_space<vmem>>, vector<32x32xf32>
    %c0_24 = arith.constant 0 : index
    %c0_25 = arith.constant 0 : index
    %41 = vector.load %arg7[%c0_24, %c0_25] : memref<32x1xf32, #tpu.memory_space<vmem>>, vector<32x1xf32>
    %c0_26 = arith.constant 0 : index
    %c0_27 = arith.constant 0 : index
    %42 = vector.load %arg8[%c0_26, %c0_27] : memref<1x32xf32, #tpu.memory_space<vmem>>, vector<1x32xf32>
    %c0_28 = arith.constant 0 : index
    %c1 = arith.constant 1 : index
    %43 = memref.load %arg11[%c0_28, %c1] : memref<1x2xf32, #tpu.memory_space<smem>>
    %cst_29 = arith.constant dense<0.000000e+00> : vector<16x32xf32>
    %44 = tpu.matmul %39, %40, %cst_29 {dimension_numbers = #tpu.dot_dimension_numbers<[1], [0], [0], [1], [0, 0, 1, 1], [], []>} : vector<16x32xf32>, vector<32x32xf32>, vector<16x32xf32> -> vector<16x32xf32>
    %cst_30 = arith.constant dense<0.000000e+00> : vector<16x1xf32>
    %45 = tpu.matmul %44, %41, %cst_30 {dimension_numbers = #tpu.dot_dimension_numbers<[1], [0], [0], [1], [0, 0, 1, 1], [], []>} : vector<16x32xf32>, vector<32x1xf32>, vector<16x1xf32> -> vector<16x1xf32>
    %cst_31 = arith.constant dense<0.000000e+00> : vector<1x16xf32>
    %46 = tpu.matmul %42, %44, %cst_31 {dimension_numbers = #tpu.dot_dimension_numbers<[1], [1], [0], [0], [0, 0, 1, 0], [], []>} : vector<1x32xf32>, vector<16x32xf32>, vector<1x16xf32> -> vector<1x16xf32>
    %47 = vector.broadcast %45 : vector<16x1xf32> to vector<16x16xf32>
    %48 = vector.broadcast %46 : vector<1x16xf32> to vector<16x16xf32>
    %49 = arith.addf %47, %48 : vector<16x16xf32>
    %50 = vector.broadcast %43 : f32 to vector<16x16xf32>
    %51 = arith.addf %49, %50 : vector<16x16xf32>
    %cst_32 = arith.constant 0.000000e+00 : f32
    %52 = vector.broadcast %cst_32 : f32 to vector<16x16xf32>
    %53 = arith.cmpf ogt, %51, %52 : vector<16x16xf32>
    %cst_33 = arith.constant 5.000000e-02 : f32
    %54 = vector.broadcast %cst_33 : f32 to vector<16x16xf32>
    %55 = arith.mulf %54, %51 : vector<16x16xf32>
    %56 = arith.select %53, %51, %55 : vector<16x16xi1>, vector<16x16xf32>
    %cst_34 = arith.constant -1.000000e+30 : f32
    %57 = vector.broadcast %cst_34 : f32 to vector<16x16xf32>
    %58 = arith.select %2, %56, %57 : vector<16x16xi1>, vector<16x16xf32>
    %cst_35 = arith.constant dense<0xFF800000> : vector<16xf32>
    %59 = vector.multi_reduction <maximumf>, %58, %cst_35 [1] : vector<16x16xf32> to vector<16xf32>
    %60 = vector.shape_cast %59 : vector<16xf32> to vector<16x1xf32>
    %61 = vector.broadcast %60 : vector<16x1xf32> to vector<16x16xf32>
    %62 = arith.subf %58, %61 : vector<16x16xf32>
    %63 = math.exp %62 : vector<16x16xf32>
    %cst_36 = arith.constant dense<0.000000e+00> : vector<16xf32>
    %64 = vector.multi_reduction <add>, %63, %cst_36 [1] : vector<16x16xf32> to vector<16xf32>
    %65 = vector.shape_cast %64 : vector<16xf32> to vector<16x1xf32>
    %66 = tpu.reciprocal %65 {approx = true} : vector<16x1xf32> -> vector<16x1xf32>
    %67 = arith.mulf %65, %66 : vector<16x1xf32>
    %cst_37 = arith.constant 2.000000e+00 : f32
    %68 = vector.broadcast %cst_37 : f32 to vector<16x1xf32>
    %69 = arith.subf %68, %67 : vector<16x1xf32>
    %70 = arith.mulf %66, %69 : vector<16x1xf32>
    %71 = vector.broadcast %70 : vector<16x1xf32> to vector<16x16xf32>
    %72 = arith.mulf %63, %71 : vector<16x16xf32>
    %cst_38 = arith.constant dense<0.000000e+00> : vector<16x32xf32>
    %73 = tpu.matmul %72, %44, %cst_38 {dimension_numbers = #tpu.dot_dimension_numbers<[1], [0], [0], [1], [0, 0, 1, 1], [], []>} : vector<16x16xf32>, vector<16x32xf32>, vector<16x32xf32> -> vector<16x32xf32>
    %cst_39 = arith.constant 0.000000e+00 : f32
    %74 = vector.broadcast %cst_39 : f32 to vector<16x32xf32>
    %75 = arith.maximumf %73, %74 : vector<16x32xf32>
    %c0_40 = arith.constant 0 : index
    %c0_41 = arith.constant 0 : index
    %76 = vector.load %arg9[%c0_40, %c0_41] : memref<32x8xf32, #tpu.memory_space<vmem>>, vector<32x8xf32>
    %cst_42 = arith.constant dense<0.000000e+00> : vector<16x8xf32>
    %77 = tpu.matmul %75, %76, %cst_42 {dimension_numbers = #tpu.dot_dimension_numbers<[1], [0], [0], [1], [0, 0, 1, 1], [], []>} : vector<16x32xf32>, vector<32x8xf32>, vector<16x8xf32> -> vector<16x8xf32>
    %c0_43 = arith.constant 0 : index
    %c0_44 = arith.constant 0 : index
    %78 = vector.load %arg10[%c0_43, %c0_44] : memref<1x8xf32, #tpu.memory_space<vmem>>, vector<1x8xf32>
    %79 = vector.broadcast %78 : vector<1x8xf32> to vector<16x8xf32>
    %80 = arith.addf %77, %79 : vector<16x8xf32>
    %cst_45 = arith.constant dense<0xFF800000> : vector<16xf32>
    %81 = vector.multi_reduction <maximumf>, %80, %cst_45 [1] : vector<16x8xf32> to vector<16xf32>
    %82 = vector.shape_cast %81 : vector<16xf32> to vector<16x1xf32>
    %83 = vector.broadcast %82 : vector<16x1xf32> to vector<16x8xf32>
    %84 = arith.subf %80, %83 : vector<16x8xf32>
    %85 = math.exp %84 : vector<16x8xf32>
    %cst_46 = arith.constant dense<0.000000e+00> : vector<16xf32>
    %86 = vector.multi_reduction <add>, %85, %cst_46 [1] : vector<16x8xf32> to vector<16xf32>
    %87 = vector.shape_cast %86 : vector<16xf32> to vector<16x1xf32>
    %88 = math.log %87 : vector<16x1xf32>
    %89 = vector.broadcast %88 : vector<16x1xf32> to vector<16x8xf32>
    %90 = arith.subf %84, %89 : vector<16x8xf32>
    %c0_47 = arith.constant 0 : index
    %c0_48 = arith.constant 0 : index
    %91 = vector.load %arg14[%c0_47, %c0_48] : memref<16x8xf32, #tpu.memory_space<vmem>>, vector<16x8xf32>
    tpu.vector_store %arg14[%c0_47, %c0_48], %90 {strides = array<i32>} : memref<16x8xf32, #tpu.memory_space<vmem>>, vector<16x8xf32>,
    %92 = tpu.iota {dimensions = array<i32: 0>} : vector<16x128xi32>
    %c0_49 = arith.constant 0 : index
    %c0_50 = arith.constant 0 : index
    %93 = vector.load %arg13[%c0_49, %c0_50] : memref<1x128xi32, #tpu.memory_space<vmem>>, vector<1x128xi32>
    %94 = vector.broadcast %93 : vector<1x128xi32> to vector<16x128xi32>
    %95 = arith.cmpi eq, %92, %94 : vector<16x128xi32>
    %96 = arith.extui %95 : vector<16x128xi1> to vector<16x128xi32>
    %97 = arith.sitofp %96 : vector<16x128xi32> to vector<16x128xf32>
    %c0_51 = arith.constant 0 : index
    %c0_52 = arith.constant 0 : index
    %98 = vector.load %arg12[%c0_51, %c0_52] : memref<1x128xi32, #tpu.memory_space<vmem>>, vector<1x128xi32>
    %99 = vector.broadcast %98 : vector<1x128xi32> to vector<16x128xi32>
    %100 = arith.cmpi eq, %92, %99 : vector<16x128xi32>
    %101 = arith.extui %100 : vector<16x128xi1> to vector<16x128xi32>
    %102 = arith.sitofp %101 : vector<16x128xi32> to vector<16x128xf32>
    %cst_53 = arith.constant dense<0.000000e+00> : vector<16x128xf32>
    %103 = tpu.matmul %72, %97, %cst_53 {dimension_numbers = #tpu.dot_dimension_numbers<[1], [0], [0], [1], [0, 0, 1, 1], [], []>} : vector<16x16xf32>, vector<16x128xf32>, vector<16x128xf32> -> vector<16x128xf32>
    %104 = arith.mulf %103, %102 : vector<16x128xf32>
    %cst_54 = arith.constant dense<0.000000e+00> : vector<128xf32>
    %105 = vector.multi_reduction <add>, %104, %cst_54 [0] : vector<16x128xf32> to vector<128xf32>
    %106 = vector.shape_cast %105 : vector<128xf32> to vector<1x128xf32>
    %c0_55 = arith.constant 0 : index
    %c0_56 = arith.constant 0 : index
    %107 = vector.load %arg15[%c0_55, %c0_56] : memref<1x128xf32, #tpu.memory_space<vmem>>, vector<1x128xf32>
    tpu.vector_store %arg15[%c0_55, %c0_56], %106 {strides = array<i32>} : memref<1x128xf32, #tpu.memory_space<vmem>>, vector<1x128xf32>,
    return
  }
  func.func @transform_0(%arg0: i32) -> (i32, i32) {
    %c0_i32 = arith.constant 0 : i32
    %c0_i32_0 = arith.constant 0 : i32
    %c0_i32_1 = arith.constant 0 : i32
    return %c0_i32, %c0_i32_0 : i32, i32
  }
  func.func @transform_1(%arg0: i32) -> (i32, i32) {
    %c0_i32 = arith.constant 0 : i32
    %c0_i32_0 = arith.constant 0 : i32
    %c0_i32_1 = arith.constant 0 : i32
    return %c0_i32, %c0_i32_0 : i32, i32
  }
  func.func @transform_2(%arg0: i32) -> (i32, i32) {
    %c0_i32 = arith.constant 0 : i32
    %c0_i32_0 = arith.constant 0 : i32
    %c0_i32_1 = arith.constant 0 : i32
    return %c0_i32, %c0_i32_0 : i32, i32
  }
  func.func @transform_3(%arg0: i32) -> (i32, i32) {
    %c0_i32 = arith.constant 0 : i32
    %c0_i32_0 = arith.constant 0 : i32
    %c0_i32_1 = arith.constant 0 : i32
    return %c0_i32, %c0_i32_0 : i32, i32
  }
  func.func @transform_4(%arg0: i32) -> (i32, i32) {
    %c0_i32 = arith.constant 0 : i32
    %c0_i32_0 = arith.constant 0 : i32
    %c0_i32_1 = arith.constant 0 : i32
    return %c0_i32, %c0_i32_0 : i32, i32
  }
  func.func @transform_5(%arg0: i32) -> (i32, i32) {
    %c0_i32 = arith.constant 0 : i32
    %c0_i32_0 = arith.constant 0 : i32
    %c0_i32_1 = arith.constant 0 : i32
    return %c0_i32, %c0_i32_0 : i32, i32
  }
  func.func @transform_6(%arg0: i32) -> (i32, i32) {
    %c0_i32 = arith.constant 0 : i32
    %c0_i32_0 = arith.constant 0 : i32
    %c0_i32_1 = arith.constant 0 : i32
    return %c0_i32, %c0_i32_0 : i32, i32
  }
  func.func @transform_7(%arg0: i32) -> (i32, i32) {
    %c0_i32 = arith.constant 0 : i32
    %c0_i32_0 = arith.constant 0 : i32
    %c0_i32_1 = arith.constant 0 : i32
    return %c0_i32, %c0_i32_0 : i32, i32
  }
  func.func @transform_8(%arg0: i32) -> (i32, i32) {
    %c0_i32 = arith.constant 0 : i32
    %c0_i32_0 = arith.constant 0 : i32
    %c0_i32_1 = arith.constant 0 : i32
    return %c0_i32, %c0_i32_0 : i32, i32
  }
  func.func @transform_9(%arg0: i32) -> (i32, i32) {
    %c0_i32 = arith.constant 0 : i32
    %c0_i32_0 = arith.constant 0 : i32
    %c0_i32_1 = arith.constant 0 : i32
    return %c0_i32, %c0_i32_0 : i32, i32
  }
  func.func @transform_10(%arg0: i32) -> (i32, i32) {
    %c0_i32 = arith.constant 0 : i32
    %c0_i32_0 = arith.constant 0 : i32
    %c0_i32_1 = arith.constant 0 : i32
    return %c0_i32, %c0_i32_0 : i32, i32
  }
  func.func @transform_11(%arg0: i32) -> (i32, i32) {
    %c0_i32 = arith.constant 0 : i32
    %c0_i32_0 = arith.constant 0 : i32
    %c0_i32_1 = arith.constant 0 : i32
    return %c0_i32, %c0_i32_0 : i32, i32
  }
  func.func @transform_12(%arg0: i32) -> (i32, i32) {
    %c0_i32 = arith.constant 0 : i32
    %c0_i32_0 = arith.constant 0 : i32
    %c0_i32_1 = arith.constant 0 : i32
    return %c0_i32, %c0_i32_0 : i32, i32
  }
  func.func @transform_13(%arg0: i32) -> (i32, i32) {
    %c0_i32 = arith.constant 0 : i32
    %c0_i32_0 = arith.constant 0 : i32
    %c0_i32_1 = arith.constant 0 : i32
    return %c0_i32, %c0_i32_0 : i32, i32
  }
  func.func @transform_14(%arg0: i32) -> (i32, i32) {
    %c0_i32 = arith.constant 0 : i32
    %c0_i32_0 = arith.constant 0 : i32
    %c0_i32_1 = arith.constant 0 : i32
    return %c0_i32, %c0_i32_0 : i32, i32
  }
}

</mosaic_0001>

<bundles_post_ra>
// kernel: tpu_custom_call.1
= control target key start
LH: loop header
LB: loop body
LE: loop exit
PB: predicated region body
PF: predicated region fallthrough
CT: control target
= control target key end

     0   :  { %20 = vsyncpa [#allocation4], 0  ;;  %s1618_s0 = inlined_call_operand.vmem [shape: f32[16,8], index: 0, kind: input, shape index: {}]   ;;  %s1619_s1 = inlined_call_operand.vmem [shape: f32[16,16], index: 1, kind: input, shape index: {}]   ;;  %s1620_s2 = inlined_call_operand.vmem [shape: f32[8,32], index: 2, kind: input, shape index: {}]   ;;  %s1621_s3 = inlined_call_operand.vmem [shape: f32[32,1], index: 3, kind: input, shape index: {}]   ;;  %s1622_s4 = inlined_call_operand.vmem [shape: f32[1,32], index: 4, kind: input, shape index: {}]   ;;  %s1623_s5 = inlined_call_operand.vmem [shape: f32[32,32], index: 5, kind: input, shape index: {}]   ;;  %s1624_s6 = inlined_call_operand.vmem [shape: f32[32,1], index: 6, kind: input, shape index: {}]   ;;  %s1625_s7 = inlined_call_operand.vmem [shape: f32[1,32], index: 7, kind: input, shape index: {}]   ;;  %s1626_s8 = inlined_call_operand.vmem [shape: f32[32,8], index: 8, kind: input, shape index: {}]   ;;  %s1627_s9 = inlined_call_operand.vmem [shape: f32[1,8], index: 9, kind: input, shape index: {}]   ;;  %s1628_s10 = inlined_call_operand.vmem [shape: f32[1,2], index: 10, kind: input, shape index: {}]   ;;  %s1629_s11 = inlined_call_operand.vmem [shape: s32[1,128], index: 11, kind: input, shape index: {}]   ;;  %s1630_s12 = inlined_call_operand.vmem [shape: s32[1,128], index: 12, kind: input, shape index: {}]   ;;  %s1631_s13 = inlined_call_operand.vmem [shape: f32[16,8], index: 13, kind: output, shape index: {0}]   ;;  %s1632_s14 = inlined_call_operand.hbm [shape: f32[1,128], index: 14, kind: output, shape index: {1}]  }
   0x1   :  { %21 = vsyncpa [#allocation3], 0  ;;  %s48_s15 = sshll.u32 %s1628_s10, 4  ;;  %s49_s15 = int_to_ptr.vmem [resolvable:$true] %s48_s15 }
   0x2   :  { %s1325_s16 = scalar_lea.vmem %s49_s15, 16  ;;  %p1330_p1 = scmp.lt.s32.totalorder %s49_s15, %s49_s15 }
   0x3   :  { %p1326_p0 = scmp.ne.s32.totalorder %s49_s15, %s1325_s16  ;;  %p1331_p2 = scmp.lt.s32.totalorder %s1325_s16, %s1325_s16 }
   0x5   :  { %p1332_p3 = por %p1331_p2, %p1330_p1 }
   0x7   :  { %p1333_p4 = pnand %p1332_p3, %p1326_p0 }
   0x9   :  { %1336 = shalt.err (!%p1333_p4)
}
   0xa   :  { %s1363_s17 = smov [#allocation2]  }
   0xb   :  { %51 = dma.vmem_to_smem %s49_s15, 16, %s1363_s17, [#allocation4]  }
   0xc   :  { %1359 = dma.done.wait [#allocation4], 16  }
   0xd   :  { %1360 = vsyncadd [#allocation4], 4294967280 }
   0xe   :  { %59 = sfence }
   0xf   :  { %v66_v0 = vld [vmem:[%s1620_s2] sm:$0xff]  ;;  %vm73_vm0 = vcmask 64512   ;;  %v65_v2 = vld [vmem:[%s1618_s0 + $0x8] sm:$0xff]  ;;  %v69_v5 = vld [vmem:[%s1621_s3 + $0x10] sm:$0xff]  ;;  %v1364_v9 = vmov 0.0|0.0   ;;  %vm1365_vm1 = vmmov 0   ;;  %v320_v21 = vlaneseq }
  0x10   :  { %v64_v1 = vld [vmem:[%s1618_s0] sm:$0xff]  ;;  %1156 = vmatprep.subr.mxu0 %v66_v0  ;;  %v68_v4 = vld [vmem:[%s1621_s3 + $0x8] sm:$0xff]  ;;  %v70_v7 = vld [vmem:[%s1621_s3 + $0x18] sm:$0xff]  ;;  %v1366_v10 = vmov 0.0   ;;  %vm155_vm2 = vcmask 261120   ;;  %v1367_v16 = vmov 0  }
  0x11   :  { %1158 = vmatprep.mubr.msk.f32.mxu0 %vm73_vm0, %v64_v1  ;;  %v67_v3 = vld [vmem:[%s1621_s3] sm:$0xff]  ;;  %1157 = vmatpush3.msra.mxu0 %v66_v0  ;;  %v1244_v8 = vpack.c.bf16 %v70_v7, %v69_v5  ;;  %vm1476_vm3 = vmpackc.low %vm155_vm2, %vm155_vm2  ;;  %v1488_v22 = vshrl.u32 %v320_v21, 7  ;;  %s72_s30 = sld [smem:[#allocation2]]  ;;  %vm337_vm6 = vcmask 130048   ;;  %v1502_v33 = vld [vmem:[%s1619_s1 + $0x8] sm:$0xff]  ;;  %s1088_s3 = sld [smem:[#allocation2 + $0x1]] }
  0x12   :  { %v1240_v6 = vpack.c.bf16 %v68_v4, %v67_v3  ;;  %1159 = vmatmul.mubr.msk.f32.vlgmr.msra.gmra.mrb[0].mxu0 %vm73_vm0, %v65_v2  ;;  %1248 = vmatprep.subr.bf16.mxu0 %v1364_v9  ;;  %v71_v15 = vld [vmem:[%s1622_s4] sm:$0x1]  ;;  %vm63_vm7 = vcmp.gt.f32.partialorder %v1502_v33, 0.0  ;;  %v450_v53 = vld [vmem:[%s1623_s5 + $0x8] sm:$0xff]  ;;  %v451_v3 = vld [vmem:[%s1623_s5 + $0x10] sm:$0xff] }
  0x13   :  { %1176 = vmatprep.mubr.msk.f32.mxu0 %vm1365_vm1, %v1366_v10  ;;  %1299 = vset.pattern.permute.xlu0 %v1367_v16  ;;  %v322_v23 = vsub.s32 0, %v1488_v22  ;;  %v1496_v28 = vld [vmem:[%s1619_s1] sm:$0xff]  ;;  %v452_v4 = vld [vmem:[%s1623_s5 + $0x18] sm:$0xff]  ;;  %v454_v7 = vld [vmem:[%s1624_s6 + $0x8] sm:$0xff]  ;;  %v952_v33 = vadd.s32 8, %v1488_v22 }
  0x14   :  { %1241 = vmatprep.subr.bf16.mxu1 %v1240_v6  ;;  %1300 = vset.pattern.permute.xlu1 %v1367_v16  ;;  %vm62_vm4 = vcmp.gt.f32.partialorder %v1496_v28, 0.0  ;;  %v449_v52 = vld [vmem:[%s1623_s5] sm:$0xff]  ;;  %v1260_v5 = vpack.c.bf16 %v452_v4, %v451_v3 }
  0x15   :  { %1243 = vmatpush3.bf16.msra.mxu1 %v1240_v6  ;;  %v1256_v54 = vpack.c.bf16 %v450_v53, %v449_v52  ;;  %v453_v6 = vld [vmem:[%s1624_s6] sm:$0xff] }
  0x16   :  { %1245 = vmatprep.subr.bf16.mxu1 %v1244_v8  ;;  %v457_v21 = vld [vmem:[%s1625_s7] sm:$0x1] }
  0x17   :  { %v326_v25 = vstv %s72_s30  ;;  %v710_v13 = vstv %s1088_s3  ;;  %v1101_v53 = vld [vmem:[%s1630_s12] ss:$0 sm:$0xff] }
  0x18   :  { %vm958_vm11 = vcmp.eq.s32.totalorder %v1488_v22, %v1101_v53  ;;  %vm959_vm12 = vcmp.eq.s32.totalorder %v952_v33, %v1101_v53 }
  0x19   :  { %1247 = vmatpush3.bf16.msra.mxu1 %v1244_v8  ;;  %v455_v8 = vld [vmem:[%s1624_s6 + $0x10] sm:$0xff]  ;;  %vm1288_vm13 = vmpackc.low %vm959_vm12, %vm958_vm11 }
  0xe5   :  { %v1160_v11 = vpop.f32.mrb[0].mxu0 }
  0xe6   :  { %v146_v12 = vpop.f32.mrb[1].mxu0 }
  0xe7   :  { %v1249_v14 = vpack.c.bf16 %v1160_v11, %v146_v12  ;;  %1169 = vmatprep.mubr.msk.f32.mxu1 %vm155_vm2, %v146_v12  ;;  %v456_v12 = vld [vmem:[%s1624_s6 + $0x18] sm:$0xff] }
  0xe8   :  { %1170 = vmatmul.mubr.msk.f32.vlgmr.msra.gmra.mrb[0].mxu1 %vm155_vm2, %v1160_v11  ;;  %v1264_v11 = vpack.c.bf16 %v454_v7, %v453_v6  ;;  %v834_v6 = vld [vmem:[%s1626_s8 + $0x10] sm:$0xff]  ;;  %v835_v7 = vld [vmem:[%s1626_s8 + $0x18] sm:$0xff] }
  0xe9   :  { %1251 = vmatpush3.bf16.xpose.msk.msra.mxu0 %vm1476_vm3, %v1249_v14  ;;  %1253 = vmatprep.subr.bf16.mxu1 %v1249_v14 }
  0xea   :  { %1255 = vmatpush3.bf16.msra.mxu1 %v1249_v14  ;;  %1257 = vmatprep.subr.bf16.mxu0 %v1256_v54  ;;  %v1268_v14 = vpack.c.bf16 %v456_v12, %v455_v8  ;;  %v1284_v8 = vpack.c.bf16 %v835_v7, %v834_v6 }
  0xeb   :  { %1265 = vmatprep.subr.bf16.mxu1 %v1264_v11 }
  0xf0   :  { %1177 = vmatmul.mubr.msk.f32.vlgmr.msra.gmra.mrb[2].mxu0 %vm155_vm2, %v71_v15 }
  0xf1   :  { %1259 = vmatpush3.bf16.msra.mxu0 %v1256_v54  ;;  %v1368_v54 = vmov 1.0|1.0  }
  0xf2   :  { %1261 = vmatprep.subr.bf16.mxu0 %v1260_v5 }
  0xf5   :  { %1263 = vmatpush3.bf16.msra.mxu0 %v1260_v5 }
  0xf6   :  { %1272 = vmatprep.subr.bf16.mxu0 %v1364_v9 }
 0x1bb   :  { %v1171_v17 = vpop.f32.mrb[0].mxu1 }
 0x1bc   :  { %v228_v18 = vpop.f32.mrb[1].mxu1 }
 0x1bd   :  { %312 = vperm.xlu0 %1299, %v228_v18  }
 0x1c1   :  { %317 = vperm.xlu0 %1299, %v1171_v17  }
 0x1c3   :  { %v306_v19 = vpop.f32.mrb[2].mxu0 }
 0x1c4   :  { %v1178_v20 = vpop.f32.mrb[3].mxu0  ;;  %v323_v24 = vrot.slane %v306_v19, %v322_v23 }
 0x23c   :  { %v313_v26 = vpop.permute.xlu0 %312 }
 0x23d   :  { %v324_v27 = vadd.f32 %v323_v24, %v313_v26 }
 0x23f   :  { %v327_v29 = vadd.f32 %v326_v25, %v324_v27 }
 0x240   :  { %v318_v30 = vpop.permute.xlu0 %317 }
 0x241   :  { %v325_v31 = vadd.f32 %v323_v24, %v318_v30  ;;  %vm329_vm5 = vcmp.gt.f32.partialorder %v327_v29, 0.0  ;;  %v331_v32 = vmul.f32 0.05, %v327_v29 }
 0x243   :  { %v328_v34 = vadd.f32 %v326_v25, %v325_v31  ;;  %v333_v35 = vsel %vm329_vm5, %v327_v29, %v331_v32 }
 0x244   :  { %v335_v36 = vsel %vm62_vm4, %v333_v35, -1e+30 }
 0x245   :  { %v338_v37 = vsel %vm337_vm6, %v335_v36, -inf  ;;  %vm330_vm8 = vcmp.gt.f32.partialorder %v328_v34, 0.0  ;;  %v332_v38 = vmul.f32 0.05, %v328_v34 }
 0x246   :  { %339 = vmax.xlane.f32.xlu1 %v338_v37 }
 0x247   :  { %v334_v39 = vsel %vm330_vm8, %v328_v34, %v332_v38 }
 0x248   :  { %v336_v40 = vsel %vm63_vm7, %v334_v39, -1e+30 }
 0x249   :  { %v341_v41 = vsel %vm337_vm6, %v336_v40, -inf }
 0x24a   :  { %342 = vmax.xlane.f32.xlu1 %v341_v41 }
 0x2d3   :  { %v340_v42 = vpop.xlane.xlu1 %339 }
 0x2d4   :  { %v344_v43 = vsub.f32 %v335_v36, %v340_v42 }
 0x2d6   :  { %v346_v44 = vmul.f32 1.442695, %v344_v43 }
 0x2d7   :  { %v343_v45 = vpop.xlane.xlu1 %342 }
 0x2d8   :  { %1301 = vpow2.f32 %v346_v44  ;;  %v345_v46 = vsub.f32 %v336_v40, %v343_v45 }
 0x2da   :  { %v348_v47 = vmul.f32 1.442695, %v345_v46 }
 0x2dc   :  { %1303 = vpow2.f32 %v348_v47 }
 0x2e2   :  { %v1302_v48 = vpop.eup %1301 }
 0x2e3   :  { %v350_v49 = vsel %vm337_vm6, %v1302_v48, 0.0 }
 0x2e4   :  { %351 = vadd.xlane.f32.xlu0 %v350_v49 }
 0x2e6   :  { %v1304_v50 = vpop.eup %1303 }
 0x2e7   :  { %v353_v51 = vsel %vm337_vm6, %v1304_v50, 0.0 }
 0x2e8   :  { %354 = vadd.xlane.f32.xlu1 %v353_v51 }
 0x371   :  { %v352_v55 = vpop.xlane.xlu0 %351 }
 0x372   :  { %1305 = vrcp.f32 %v352_v55 }
 0x375   :  { %v355_v56 = vpop.xlane.xlu1 %354 }
 0x376   :  { %1307 = vrcp.f32 %v355_v56 }
 0x37c   :  { %v1306_v57 = vpop.eup %1305 }
 0x37d   :  { %v358_v58 = vmul.f32 %v1306_v57, %v352_v55  ;;  %v832_v55 = vld [vmem:[%s1626_s8] sm:$0xff] }
 0x37f   :  { %v360_v59 = vsub.f32 2.0, %v358_v58 }
 0x380   :  { %v1308_v60 = vpop.eup %1307 }
 0x381   :  { %v362_v61 = vmul.f32 %v1306_v57, %v360_v59  ;;  %v359_v62 = vmul.f32 %v1308_v60, %v355_v56  ;;  %v833_v56 = vld [vmem:[%s1626_s8 + $0x8] sm:$0xff] }
 0x382   :  { %v1280_v57 = vpack.c.bf16 %v833_v56, %v832_v55 }
 0x383   :  { %v364_v63 = vmul.f32 %v1302_v48, %v362_v61  ;;  %v361_v0 = vsub.f32 2.0, %v359_v62 }
 0x385   :  { %v363_v1 = vmul.f32 %v1308_v60, %v361_v0  ;;  %1183 = vmatprep.mubr.msk.f32.mxu1 %vm337_vm6, %v364_v63 }
 0x387   :  { %v365_v2 = vmul.f32 %v1304_v50, %v363_v1 }
 0x389   :  { %1184 = vmatmul.mubr.msk.f32.vlgmr.msra.gmra.mrb[2].mxu1 %vm337_vm6, %v365_v2 }
 0x38a   :  { %1267 = vmatpush3.bf16.msra.mxu1 %v1264_v11  ;;  %v1104_v11 = vld [vmem:[%s1629_s11] ss:$0 sm:$0xff] }
 0x38b   :  { %1269 = vmatprep.subr.bf16.mxu1 %v1268_v14  ;;  %vm970_vm14 = vcmp.eq.s32.totalorder %v952_v33, %v1104_v11  ;;  %vm969_vm15 = vcmp.eq.s32.totalorder %v1488_v22, %v1104_v11 }
 0x38c   :  { %v1106_v12 = vsel %vm970_vm14, 1.0, %v1366_v10 }
 0x38e   :  { %1271 = vmatpush3.bf16.msra.mxu1 %v1268_v14  ;;  %v1105_v14 = vsel %vm969_vm15, 1.0, %v1366_v10 }
 0x45c   :  { %v1185_v9 = vpop.f32.mrb[2].mxu1 }
 0x45d   :  { %v438_v15 = vpop.f32.mrb[3].mxu1  ;;  %v448_v17 = vmax.f32 %v1185_v9, 0.0 }
 0x45e   :  { %v447_v16 = vmax.f32 %v438_v15, 0.0 }
 0x460   :  { %1194 = vmatprep.mubr.msk.f32.mxu0 %vm155_vm2, %v447_v16 }
 0x461   :  { %1195 = vmatmul.mubr.msk.f32.vlgmr.msra.gmra.mrb[4].mxu0 %vm155_vm2, %v448_v17 }
 0x462   :  { %1212 = vmatprep.mubr.msk.f32.mxu0 %vm1365_vm1, %v1366_v10  ;;  %v1098_v10 = vld [vmem:[%s1627_s9] ss:$0 sm:$0xff]  ;;  %s1369_s9 = smov [#allocation5]  }
 0x463   :  { %s1068_s10 = sshll.u32 %s1369_s9, 4  ;;  %s1069_s10 = int_to_ptr.vmem [resolvable:$true] %s1068_s10 }
 0x464   :  { %s1337_s22 = scalar_lea.vmem %s1069_s10, 16  ;;  %s1341_s23 = scalar_lea.vmem %s1069_s10, 32 }
 0x465   :  { %p1338_p5 = scmp.ne.s32.totalorder %s1069_s10, %s1337_s22  ;;  %p1342_p6 = scmp.lt.s32.totalorder %s1069_s10, %s1069_s10 }
 0x466   :  { %p1343_p7 = scmp.lt.s32.totalorder %s1341_s23, %s1337_s22 }
 0x468   :  { %p1344_p8 = por %p1343_p7, %p1342_p6 }
 0x46a   :  { %p1345_p9 = pnand %p1344_p8, %p1338_p5 }
 0x534   :  { %v1196_v18 = vpop.f32.mrb[4].mxu0 }
 0x535   :  { %v531_v19 = vpop.f32.mrb[5].mxu0 }
 0x536   :  { %v1273_v20 = vpack.c.bf16 %v1196_v18, %v531_v19  ;;  %1205 = vmatprep.mubr.msk.f32.mxu1 %vm155_vm2, %v531_v19 }
 0x537   :  { %1206 = vmatmul.mubr.msk.f32.vlgmr.msra.gmra.mrb[4].mxu1 %vm155_vm2, %v1196_v18 }
 0x538   :  { %1275 = vmatpush3.bf16.xpose.msk.msra.mxu0 %vm1476_vm3, %v1273_v20  ;;  %1277 = vmatprep.subr.bf16.mxu1 %v1273_v20 }
 0x539   :  { %1279 = vmatpush3.bf16.msra.mxu1 %v1273_v20  ;;  %1289 = vmatprep.subr.msk.bf16.mxu0 %vm1288_vm13, %v1368_v54 }
 0x53a   :  { %1281 = vmatprep.subr.bf16.mxu1 %v1280_v57 }
 0x53f   :  { %1213 = vmatmul.mubr.msk.f32.vlgmr.msra.gmra.mrb[6].mxu0 %vm155_vm2, %v457_v21 }
 0x540   :  { %1291 = vmatpush3.bf16.msk.msra.mxu0 %vm1288_vm13, %v1368_v54 }
 0x60a   :  { %v1207_v24 = vpop.f32.mrb[4].mxu1 }
 0x60b   :  { %v612_v25 = vpop.f32.mrb[5].mxu1 }
 0x60c   :  { %696 = vperm.xlu1 %1300, %v612_v25  }
 0x610   :  { %701 = vperm.xlu1 %1300, %v1207_v24  }
 0x612   :  { %v690_v26 = vpop.f32.mrb[6].mxu0 }
 0x613   :  { %v1214_v27 = vpop.f32.mrb[7].mxu0  ;;  %v707_v29 = vrot.slane %v690_v26, %v322_v23 }
 0x68b   :  { %v697_v30 = vpop.permute.xlu1 %696 }
 0x68c   :  { %v708_v31 = vadd.f32 %v707_v29, %v697_v30 }
 0x68e   :  { %v711_v32 = vadd.f32 %v710_v13, %v708_v31 }
 0x68f   :  { %v702_v34 = vpop.permute.xlu1 %701 }
 0x690   :  { %v709_v35 = vadd.f32 %v707_v29, %v702_v34  ;;  %vm713_vm9 = vcmp.gt.f32.partialorder %v711_v32, 0.0  ;;  %v715_v36 = vmul.f32 0.05, %v711_v32 }
 0x692   :  { %v712_v37 = vadd.f32 %v710_v13, %v709_v35  ;;  %v717_v38 = vsel %vm713_vm9, %v711_v32, %v715_v36 }
 0x693   :  { %v719_v39 = vsel %vm62_vm4, %v717_v38, -1e+30 }
 0x694   :  { %v721_v40 = vsel %vm337_vm6, %v719_v39, -inf  ;;  %vm714_vm10 = vcmp.gt.f32.partialorder %v712_v37, 0.0  ;;  %v716_v41 = vmul.f32 0.05, %v712_v37 }
 0x695   :  { %722 = vmax.xlane.f32.xlu1 %v721_v40 }
 0x696   :  { %v718_v42 = vsel %vm714_vm10, %v712_v37, %v716_v41 }
 0x697   :  { %v720_v23 = vsel %vm63_vm7, %v718_v42, -1e+30 }
 0x698   :  { %v724_v43 = vsel %vm337_vm6, %v720_v23, -inf }
 0x699   :  { %725 = vmax.xlane.f32.xlu0 %v724_v43 }
 0x722   :  { %v723_v44 = vpop.xlane.xlu1 %722 }
 0x723   :  { %v727_v45 = vsub.f32 %v719_v39, %v723_v44 }
 0x725   :  { %v729_v46 = vmul.f32 1.442695, %v727_v45 }
 0x726   :  { %v726_v47 = vpop.xlane.xlu0 %725 }
 0x727   :  { %1309 = vpow2.f32 %v729_v46  ;;  %v728_v48 = vsub.f32 %v720_v23, %v726_v47 }
 0x729   :  { %v731_v28 = vmul.f32 1.442695, %v728_v48 }
 0x72b   :  { %1311 = vpow2.f32 %v731_v28 }
 0x731   :  { %v1310_v49 = vpop.eup %1309 }
 0x732   :  { %v733_v50 = vsel %vm337_vm6, %v1310_v49, 0.0 }
 0x733   :  { %734 = vadd.xlane.f32.xlu0 %v733_v50 }
 0x735   :  { %v1312_v51 = vpop.eup %1311 }
 0x736   :  { %v736_v52 = vsel %vm337_vm6, %v1312_v51, 0.0 }
 0x737   :  { %737 = vadd.xlane.f32.xlu0 %v736_v52 }
 0x7c0   :  { %v735_v58 = vpop.xlane.xlu0 %734 }
 0x7c1   :  { %1313 = vrcp.f32 %v735_v58 }
 0x7c4   :  { %v738_v59 = vpop.xlane.xlu0 %737 }
 0x7c5   :  { %1315 = vrcp.f32 %v738_v59 }
 0x7cb   :  { %v1314_v60 = vpop.eup %1313 }
 0x7cc   :  { %v741_v61 = vmul.f32 %v1314_v60, %v735_v58 }
 0x7ce   :  { %v743_v62 = vsub.f32 2.0, %v741_v61 }
 0x7cf   :  { %v1316_v63 = vpop.eup %1315 }
 0x7d0   :  { %v745_v0 = vmul.f32 %v1314_v60, %v743_v62  ;;  %v742_v1 = vmul.f32 %v1316_v63, %v738_v59 }
 0x7d2   :  { %v747_v2 = vmul.f32 %v1310_v49, %v745_v0  ;;  %v744_v3 = vsub.f32 2.0, %v742_v1 }
 0x7d4   :  { %v746_v4 = vmul.f32 %v1316_v63, %v744_v3  ;;  %1219 = vmatprep.mubr.msk.f32.mxu1 %vm337_vm6, %v747_v2  ;;  %1237 = vmatprep.mubr.msk.f32.mxu0 %vm337_vm6, %v747_v2 }
 0x7d6   :  { %v748_v5 = vmul.f32 %v1312_v51, %v746_v4 }
 0x7d8   :  { %1220 = vmatmul.mubr.msk.f32.vlgmr.msra.gmra.mrb[6].mxu1 %vm337_vm6, %v748_v5  ;;  %1238 = vmatmul.mubr.msk.f32.vlgmr.msra.gmra.mrb[8].mxu0 %vm337_vm6, %v748_v5 }
 0x7d9   :  { %1283 = vmatpush3.bf16.msra.mxu1 %v1280_v57 }
 0x7da   :  { %1285 = vmatprep.subr.bf16.mxu1 %v1284_v8 }
 0x7dd   :  { %1287 = vmatpush3.bf16.msra.mxu1 %v1284_v8 }
 0x8ab   :  { %v1221_v9 = vpop.f32.mrb[6].mxu1  ;;  %v1239_v15 = vpop.f32.mrb[8].mxu0 }
 0x8ac   :  { %v1051_v16 = vmul.f32 %v1239_v15, %v1106_v12  ;;  %v821_v17 = vpop.f32.mrb[7].mxu1  ;;  %v1041_v18 = vpop.f32.mrb[9].mxu0  ;;  %v831_v21 = vmax.f32 %v1221_v9, 0.0 }
 0x8ad   :  { %v830_v19 = vmax.f32 %v821_v17, 0.0  ;;  %v1050_v20 = vmul.f32 %v1105_v14, %v1041_v18 }
 0x8af   :  { %v1052_v24 = vadd.f32 %v1051_v16, %v1050_v20  ;;  %1230 = vmatprep.mubr.msk.f32.mxu1 %vm155_vm2, %v830_v19 }
 0x8b0   :  { %1231 = vmatmul.mubr.msk.f32.vlgmr.msra.gmra.mrb[8].mxu1 %vm155_vm2, %v831_v21 }
 0x8b1   :  { %v1053_v25 = vrot.slane %v1052_v24, 4 }
 0x8b3   :  { %v1054_v26 = vadd.f32 %v1053_v25, %v1052_v24 }
 0x8b5   :  { %v1055_v22 = vrot.slane %v1054_v26, 2 }
 0x8b7   :  { %v1056_v27 = vadd.f32 %v1055_v22, %v1054_v26 }
 0x8b9   :  { %v1057_v29 = vrot.slane %v1056_v27, 1 }
 0x8bb   :  { %v1058_v13 = vadd.f32 %v1057_v29, %v1056_v27 }
 0x8bd   :  { %1059 = vst [vmem:[#allocation5] sm:$0x1] %v1058_v13 }
 0x983   :  { %v1232_v30 = vpop.f32.mrb[8].mxu1 }
 0x984   :  { %v915_v31 = vpop.f32.mrb[9].mxu1  ;;  %v921_v34 = vadd.f32 %v1232_v30, %v1098_v10 }
 0x985   :  { %v916_v32 = vadd.f32 %v1098_v10, %v915_v31 }
 0x986   :  { %v927_v36 = vsel %vm73_vm0, %v921_v34, -inf }
 0x987   :  { %v924_v35 = vsel %vm73_vm0, %v916_v32, -inf }
 0x988   :  { %925 = vmax.xlane.f32.xlu0 %v924_v35 }
 0x98c   :  { %928 = vmax.xlane.f32.xlu0 %v927_v36 }
 0xa15   :  { %v926_v37 = vpop.xlane.xlu0 %925 }
 0xa16   :  { %v930_v38 = vsub.f32 %v916_v32, %v926_v37 }
 0xa18   :  { %v932_v39 = vmul.f32 1.442695, %v930_v38 }
 0xa19   :  { %v929_v40 = vpop.xlane.xlu0 %928 }
 0xa1a   :  { %1317 = vpow2.f32 %v932_v39  ;;  %v931_v41 = vsub.f32 %v921_v34, %v929_v40 }
 0xa1c   :  { %v934_v42 = vmul.f32 1.442695, %v931_v41 }
 0xa1e   :  { %1319 = vpow2.f32 %v934_v42 }
 0xa24   :  { %v1318_v23 = vpop.eup %1317 }
 0xa25   :  { %v936_v43 = vsel %vm73_vm0, %v1318_v23, 0.0 }
 0xa26   :  { %937 = vadd.xlane.f32.xlu0 %v936_v43 }
 0xa28   :  { %v1320_v44 = vpop.eup %1319 }
 0xa29   :  { %v939_v45 = vsel %vm73_vm0, %v1320_v44, 0.0 }
 0xa2a   :  { %940 = vadd.xlane.f32.xlu0 %v939_v45 }
 0xa2b   :  { %1348 = shalt.err (!%p1345_p9)
}
 0xa2c   :  { %s1349_s26 = scalar_lea.hbm %s1632_s14, 16 }
 0xa2d   :  { %p1350_p10 = scmp.ne.s32.totalorder %s1632_s14, %s1349_s26  ;;  %p1353_p11 = scmp.lt.u32.totalorder %s1349_s26, %s1632_s14 }
 0xa2f   :  { %p1355_p12 = pnand %p1353_p11, %p1350_p10 }
 0xa31   :  { %1358 = shalt.err (!%p1355_p12)
}
 0xa32   :  { %1071 = dma.vmem_to_hbm [thread:$0]  %s1069_s10, 16, %s1632_s14, [#allocation3]  }
 0xab3   :  { %v938_v46 = vpop.xlane.xlu0 %937 }
 0xab4   :  { %1321 = vlog2.f32 %v938_v46 }
 0xab7   :  { %v941_v47 = vpop.xlane.xlu0 %940 }
 0xab8   :  { %1323 = vlog2.f32 %v941_v47 }
 0xabe   :  { %v1322_v48 = vpop.eup %1321 }
 0xabf   :  { %v943_v28 = vmul.f32 0.6931472, %v1322_v48 }
 0xac1   :  { %v946_v49 = vsub.f32 %v930_v38, %v943_v28 }
 0xac2   :  { %v1324_v50 = vpop.eup %1323 }
 0xac3   :  { %948 = vst.msk [vmem:[%s1631_s13] sm:$0xff] %vm73_vm0, %v946_v49  ;;  %v945_v51 = vmul.f32 0.6931472, %v1324_v50 }
 0xac5   :  { %v947_v52 = vsub.f32 %v931_v41, %v945_v51 }
 0xac7   :  { %949 = vst.msk [vmem:[%s1631_s13 + $0x8] sm:$0xff] %vm73_vm0, %v947_v52 }
 0xac8   :  { %1361 = dma.done.wait [#allocation3], 16  }
 0xac9   :  { %1362 = vsyncadd [#allocation3], 4294967280 }
 0xaca   :  { %1077 = vsyncpa [#allocation3], 1 }
 0xacb   :  { %1078 = vsyncpa [#allocation4], 1 }

</bundles_post_ra>
